<compile_context>
chip_gen: v7x
topology: tpu7x:2x2x1
jax: 0.10.0
libtpu: 0.0.40
codegen_flags: <defaults>
</compile_context>

<pallas_src>
import functools

import jax
import jax.numpy as jnp
from jax.experimental import pallas as pl
from jax.experimental.pallas import tpu as pltpu

SUBLANES = 8      # batch padded to a full sublane group
OUT_LANES = 128   # lane-dense fc output slab width


def lstm_kernel(x2d_ref, wih_ref, whh_ref, b_ref, wfc_ref, bfc_ref, out_ref,
                *, seq_len, batch_pad, hidden_size):
    T, B, H = seq_len, batch_pad, hidden_size

    # ---- Hoisted input projection: one (T*B, I) x (I, 4H) MXU matmul --------
    xproj = (jnp.dot(x2d_ref[...], wih_ref[...],
                     preferred_element_type=jnp.float32)
             + b_ref[...])                                    # (T*B, 4H)

    whh = whh_ref[...]                                        # (H, 4H)

    def activate(gates, c_prev, *, first):
        # Full-width sigmoid + full-width tanh over the 128-lane gate row
        # (4H == 128), then lane-slice: same EUP vreg count as narrow ops but
        # no slice->narrow-op relayout on the dependent chain.
        sig = jax.nn.sigmoid(gates)
        tnh = jnp.tanh(gates)
        i = sig[:, 0 * H:1 * H]
        o = sig[:, 3 * H:4 * H]
        g = tnh[:, 2 * H:3 * H]
        if first:
            c_new = i * g                                     # c0 == 0 -> skip f*c
        else:
            f = sig[:, 1 * H:2 * H]
            c_new = f * c_prev + i * g
        h_new = o * jnp.tanh(c_new)
        return h_new, c_new

    # ---- Step 0 peeled: h0 = c0 = 0 -> no h @ W_hh matmul -------------------
    h, c = activate(xproj[0:B, :], None, first=True)

    # ---- Remaining steps, fully unrolled (T is a static Python int) ---------
    # Every slice start t*B is a multiple of 8, so each step reads a clean
    # (8, 128) tile of xproj.
    for t in range(1, T):
        gates = (xproj[t * B:(t + 1) * B, :]
                 + jnp.dot(h, whh, preferred_element_type=jnp.float32))
        h, c = activate(gates, c, first=False)

    # ---- ReLU(h_T) -> fc, written as a lane-dense (8, 128) slab -------------
    feat = jnp.maximum(h, 0.0)
    z = (jnp.dot(feat, wfc_ref[...], preferred_element_type=jnp.float32)
         + bfc_ref[...])
    out_ref[...] = z.astype(out_ref.dtype)


def lstm_forward(x, params, *, hidden_size, output_size):
    """x: (B, T, I) float32 (batch_first, same as the PyTorch module)."""
    B, T, I = x.shape
    H = hidden_size
    B_pad = ((B + SUBLANES - 1) // SUBLANES) * SUBLANES       # multiple of 8

    # Time-major, batch zero-padded to a full sublane group, flattened so the
    # input projection is a single MXU matmul.
    x_tm = jnp.transpose(x, (1, 0, 2))                        # (T, B, I)
    x_tm = jnp.pad(x_tm, ((0, 0), (0, B_pad - B), (0, 0)))    # (T, B_pad, I)
    x2d = x_tm.reshape(T * B_pad, I)

    # Pre-transpose weights; fold the two LSTM bias vectors.
    wih_t = params["w_ih"].T                                   # (I, 4H)
    whh_t = params["w_hh"].T                                   # (H, 4H)
    b = (params["b_ih"] + params["b_hh"]).reshape(1, 4 * H)

    # fc weights zero-padded to 128 output lanes for an unmasked store.
    wfc_t = params["w_fc"].T                                   # (H, O)
    wfc_pad = jnp.zeros((H, OUT_LANES), jnp.float32).at[:, :output_size].set(wfc_t)
    bfc_pad = jnp.zeros((1, OUT_LANES), jnp.float32).at[:, :output_size].set(
        params["b_fc"].reshape(1, -1))

    kernel = functools.partial(lstm_kernel, seq_len=T, batch_pad=B_pad,
                               hidden_size=H)
    out_pad = pl.pallas_call(
        kernel,
        out_shape=jax.ShapeDtypeStruct((B_pad, OUT_LANES), jnp.float32),
        in_specs=[pl.BlockSpec(memory_space=pltpu.MemorySpace.VMEM)] * 6,
        out_specs=pl.BlockSpec(memory_space=pltpu.MemorySpace.VMEM),
    )(x2d, wih_t, whh_t, b, wfc_pad, bfc_pad)
    return out_pad[:B, :output_size]


def _reference(x, params, *, hidden_size):
    """Pure-JAX reference mirroring the PyTorch forward."""
    H = hidden_size
    B, T, _ = x.shape
    h = c = jnp.zeros((B, H), jnp.float32)
    for t in range(T):
        g = (x[:, t] @ params["w_ih"].T + h @ params["w_hh"].T
             + params["b_ih"] + params["b_hh"])
        i = jax.nn.sigmoid(g[:, 0 * H:1 * H])
        f = jax.nn.sigmoid(g[:, 1 * H:2 * H])
        gg = jnp.tanh(g[:, 2 * H:3 * H])
        o = jax.nn.sigmoid(g[:, 3 * H:4 * H])
        c = f * c + i * gg
        h = o * jnp.tanh(c)
    feat = jnp.maximum(h, 0.0)
    return feat @ params["w_fc"].T + params["b_fc"]


def init_params(key, input_size, hidden_size, output_size):
    H = hidden_size
    ks = jax.random.split(key, 6)
    s_lstm = 1.0 / jnp.sqrt(H)
    s_fc = 1.0 / jnp.sqrt(H)
    u = lambda k, shape, s: jax.random.uniform(k, shape, jnp.float32, -s, s)
    return {
        "w_ih": u(ks[0], (4 * H, input_size), s_lstm),
        "w_hh": u(ks[1], (4 * H, H), s_lstm),
        "b_ih": u(ks[2], (4 * H,), s_lstm),
        "b_hh": u(ks[3], (4 * H,), s_lstm),
        "w_fc": u(ks[4], (output_size, H), s_fc),
        "b_fc": u(ks[5], (output_size,), s_fc),
    }


if __name__ == "__main__":
    INPUT_SIZE, HIDDEN_SIZE, OUTPUT_SIZE = 16, 32, 4
    BATCH, SEQ = 2, 8

    key = jax.random.PRNGKey(0)
    k_x, k_p = jax.random.split(key)
    x = jax.random.normal(k_x, (BATCH, SEQ, INPUT_SIZE), jnp.float32)
    params = init_params(k_p, INPUT_SIZE, HIDDEN_SIZE, OUTPUT_SIZE)

    out = lstm_forward(x, params, hidden_size=HIDDEN_SIZE, output_size=OUTPUT_SIZE)
    out = jax.block_until_ready(out)

    ref = _reference(x, params, hidden_size=HIDDEN_SIZE)
    assert out.shape == (BATCH, OUTPUT_SIZE)
    assert jnp.max(jnp.abs(out - ref)) < 1e-4

    print("KERNEL_OK")
</pallas_src>

<mosaic_0001>
module attributes {stable_mosaic.version = 11 : i64} {
  func.func @lstm_kernel(%arg0: memref<64x16xf32, #tpu.memory_space<vmem>>, %arg1: memref<16x128xf32, #tpu.memory_space<vmem>>, %arg2: memref<32x128xf32, #tpu.memory_space<vmem>>, %arg3: memref<1x128xf32, #tpu.memory_space<vmem>>, %arg4: memref<32x128xf32, #tpu.memory_space<vmem>>, %arg5: memref<1x128xf32, #tpu.memory_space<vmem>>, %arg6: memref<8x128xf32, #tpu.memory_space<vmem>>) attributes {dimension_semantics = [], scalar_prefetch = 0 : i64, scratch_operands = 0 : i64, tpu.core_type = #tpu.core_type<tc>} {
    %c0 = arith.constant 0 : index
    %c0_0 = arith.constant 0 : index
    %0 = vector.load %arg0[%c0, %c0_0] : memref<64x16xf32, #tpu.memory_space<vmem>>, vector<64x16xf32>
    %c0_1 = arith.constant 0 : index
    %c0_2 = arith.constant 0 : index
    %1 = vector.load %arg1[%c0_1, %c0_2] : memref<16x128xf32, #tpu.memory_space<vmem>>, vector<16x128xf32>
    %cst = arith.constant dense<0.000000e+00> : vector<64x128xf32>
    %2 = tpu.matmul %0, %1, %cst {dimension_numbers = #tpu.dot_dimension_numbers<[1], [0], [0], [1], [0, 0, 1, 1], [], []>} : vector<64x16xf32>, vector<16x128xf32>, vector<64x128xf32> -> vector<64x128xf32>
    %c0_3 = arith.constant 0 : index
    %c0_4 = arith.constant 0 : index
    %3 = vector.load %arg3[%c0_3, %c0_4] : memref<1x128xf32, #tpu.memory_space<vmem>>, vector<1x128xf32>
    %4 = vector.broadcast %3 : vector<1x128xf32> to vector<64x128xf32>
    %5 = arith.addf %2, %4 : vector<64x128xf32>
    %c0_5 = arith.constant 0 : index
    %c0_6 = arith.constant 0 : index
    %6 = vector.load %arg2[%c0_5, %c0_6] : memref<32x128xf32, #tpu.memory_space<vmem>>, vector<32x128xf32>
    %7 = vector.extract_strided_slice %5 {offsets = [0, 0], sizes = [8, 128], strides = [1, 1]} : vector<64x128xf32> to vector<8x128xf32>
    %8 = arith.negf %7 : vector<8x128xf32>
    %9 = math.exp %8 : vector<8x128xf32>
    %cst_7 = arith.constant 1.000000e+00 : f32
    %10 = vector.broadcast %cst_7 : f32 to vector<8x128xf32>
    %11 = arith.addf %10, %9 : vector<8x128xf32>
    %12 = arith.divf %10, %11 : vector<8x128xf32>
    %13 = math.tanh %7 : vector<8x128xf32>
    %14 = vector.extract_strided_slice %12 {offsets = [0, 0], sizes = [8, 32], strides = [1, 1]} : vector<8x128xf32> to vector<8x32xf32>
    %15 = vector.extract_strided_slice %12 {offsets = [0, 96], sizes = [8, 32], strides = [1, 1]} : vector<8x128xf32> to vector<8x32xf32>
    %16 = vector.extract_strided_slice %13 {offsets = [0, 64], sizes = [8, 32], strides = [1, 1]} : vector<8x128xf32> to vector<8x32xf32>
    %17 = arith.mulf %14, %16 : vector<8x32xf32>
    %18 = math.tanh %17 : vector<8x32xf32>
    %19 = arith.mulf %15, %18 : vector<8x32xf32>
    %20 = vector.extract_strided_slice %5 {offsets = [8, 0], sizes = [8, 128], strides = [1, 1]} : vector<64x128xf32> to vector<8x128xf32>
    %cst_8 = arith.constant dense<0.000000e+00> : vector<8x128xf32>
    %21 = tpu.matmul %19, %6, %cst_8 {dimension_numbers = #tpu.dot_dimension_numbers<[1], [0], [0], [1], [0, 0, 1, 1], [], []>} : vector<8x32xf32>, vector<32x128xf32>, vector<8x128xf32> -> vector<8x128xf32>
    %22 = arith.addf %20, %21 : vector<8x128xf32>
    %23 = arith.negf %22 : vector<8x128xf32>
    %24 = math.exp %23 : vector<8x128xf32>
    %cst_9 = arith.constant 1.000000e+00 : f32
    %25 = vector.broadcast %cst_9 : f32 to vector<8x128xf32>
    %26 = arith.addf %25, %24 : vector<8x128xf32>
    %27 = arith.divf %25, %26 : vector<8x128xf32>
    %28 = math.tanh %22 : vector<8x128xf32>
    %29 = vector.extract_strided_slice %27 {offsets = [0, 0], sizes = [8, 32], strides = [1, 1]} : vector<8x128xf32> to vector<8x32xf32>
    %30 = vector.extract_strided_slice %27 {offsets = [0, 96], sizes = [8, 32], strides = [1, 1]} : vector<8x128xf32> to vector<8x32xf32>
    %31 = vector.extract_strided_slice %28 {offsets = [0, 64], sizes = [8, 32], strides = [1, 1]} : vector<8x128xf32> to vector<8x32xf32>
    %32 = vector.extract_strided_slice %27 {offsets = [0, 32], sizes = [8, 32], strides = [1, 1]} : vector<8x128xf32> to vector<8x32xf32>
    %33 = arith.mulf %32, %17 : vector<8x32xf32>
    %34 = arith.mulf %29, %31 : vector<8x32xf32>
    %35 = arith.addf %33, %34 : vector<8x32xf32>
    %36 = math.tanh %35 : vector<8x32xf32>
    %37 = arith.mulf %30, %36 : vector<8x32xf32>
    %38 = vector.extract_strided_slice %5 {offsets = [16, 0], sizes = [8, 128], strides = [1, 1]} : vector<64x128xf32> to vector<8x128xf32>
    %cst_10 = arith.constant dense<0.000000e+00> : vector<8x128xf32>
    %39 = tpu.matmul %37, %6, %cst_10 {dimension_numbers = #tpu.dot_dimension_numbers<[1], [0], [0], [1], [0, 0, 1, 1], [], []>} : vector<8x32xf32>, vector<32x128xf32>, vector<8x128xf32> -> vector<8x128xf32>
    %40 = arith.addf %38, %39 : vector<8x128xf32>
    %41 = arith.negf %40 : vector<8x128xf32>
    %42 = math.exp %41 : vector<8x128xf32>
    %cst_11 = arith.constant 1.000000e+00 : f32
    %43 = vector.broadcast %cst_11 : f32 to vector<8x128xf32>
    %44 = arith.addf %43, %42 : vector<8x128xf32>
    %45 = arith.divf %43, %44 : vector<8x128xf32>
    %46 = math.tanh %40 : vector<8x128xf32>
    %47 = vector.extract_strided_slice %45 {offsets = [0, 0], sizes = [8, 32], strides = [1, 1]} : vector<8x128xf32> to vector<8x32xf32>
    %48 = vector.extract_strided_slice %45 {offsets = [0, 96], sizes = [8, 32], strides = [1, 1]} : vector<8x128xf32> to vector<8x32xf32>
    %49 = vector.extract_strided_slice %46 {offsets = [0, 64], sizes = [8, 32], strides = [1, 1]} : vector<8x128xf32> to vector<8x32xf32>
    %50 = vector.extract_strided_slice %45 {offsets = [0, 32], sizes = [8, 32], strides = [1, 1]} : vector<8x128xf32> to vector<8x32xf32>
    %51 = arith.mulf %50, %35 : vector<8x32xf32>
    %52 = arith.mulf %47, %49 : vector<8x32xf32>
    %53 = arith.addf %51, %52 : vector<8x32xf32>
    %54 = math.tanh %53 : vector<8x32xf32>
    %55 = arith.mulf %48, %54 : vector<8x32xf32>
    %56 = vector.extract_strided_slice %5 {offsets = [24, 0], sizes = [8, 128], strides = [1, 1]} : vector<64x128xf32> to vector<8x128xf32>
    %cst_12 = arith.constant dense<0.000000e+00> : vector<8x128xf32>
    %57 = tpu.matmul %55, %6, %cst_12 {dimension_numbers = #tpu.dot_dimension_numbers<[1], [0], [0], [1], [0, 0, 1, 1], [], []>} : vector<8x32xf32>, vector<32x128xf32>, vector<8x128xf32> -> vector<8x128xf32>
    %58 = arith.addf %56, %57 : vector<8x128xf32>
    %59 = arith.negf %58 : vector<8x128xf32>
    %60 = math.exp %59 : vector<8x128xf32>
    %cst_13 = arith.constant 1.000000e+00 : f32
    %61 = vector.broadcast %cst_13 : f32 to vector<8x128xf32>
    %62 = arith.addf %61, %60 : vector<8x128xf32>
    %63 = arith.divf %61, %62 : vector<8x128xf32>
    %64 = math.tanh %58 : vector<8x128xf32>
    %65 = vector.extract_strided_slice %63 {offsets = [0, 0], sizes = [8, 32], strides = [1, 1]} : vector<8x128xf32> to vector<8x32xf32>
    %66 = vector.extract_strided_slice %63 {offsets = [0, 96], sizes = [8, 32], strides = [1, 1]} : vector<8x128xf32> to vector<8x32xf32>
    %67 = vector.extract_strided_slice %64 {offsets = [0, 64], sizes = [8, 32], strides = [1, 1]} : vector<8x128xf32> to vector<8x32xf32>
    %68 = vector.extract_strided_slice %63 {offsets = [0, 32], sizes = [8, 32], strides = [1, 1]} : vector<8x128xf32> to vector<8x32xf32>
    %69 = arith.mulf %68, %53 : vector<8x32xf32>
    %70 = arith.mulf %65, %67 : vector<8x32xf32>
    %71 = arith.addf %69, %70 : vector<8x32xf32>
    %72 = math.tanh %71 : vector<8x32xf32>
    %73 = arith.mulf %66, %72 : vector<8x32xf32>
    %74 = vector.extract_strided_slice %5 {offsets = [32, 0], sizes = [8, 128], strides = [1, 1]} : vector<64x128xf32> to vector<8x128xf32>
    %cst_14 = arith.constant dense<0.000000e+00> : vector<8x128xf32>
    %75 = tpu.matmul %73, %6, %cst_14 {dimension_numbers = #tpu.dot_dimension_numbers<[1], [0], [0], [1], [0, 0, 1, 1], [], []>} : vector<8x32xf32>, vector<32x128xf32>, vector<8x128xf32> -> vector<8x128xf32>
    %76 = arith.addf %74, %75 : vector<8x128xf32>
    %77 = arith.negf %76 : vector<8x128xf32>
    %78 = math.exp %77 : vector<8x128xf32>
    %cst_15 = arith.constant 1.000000e+00 : f32
    %79 = vector.broadcast %cst_15 : f32 to vector<8x128xf32>
    %80 = arith.addf %79, %78 : vector<8x128xf32>
    %81 = arith.divf %79, %80 : vector<8x128xf32>
    %82 = math.tanh %76 : vector<8x128xf32>
    %83 = vector.extract_strided_slice %81 {offsets = [0, 0], sizes = [8, 32], strides = [1, 1]} : vector<8x128xf32> to vector<8x32xf32>
    %84 = vector.extract_strided_slice %81 {offsets = [0, 96], sizes = [8, 32], strides = [1, 1]} : vector<8x128xf32> to vector<8x32xf32>
    %85 = vector.extract_strided_slice %82 {offsets = [0, 64], sizes = [8, 32], strides = [1, 1]} : vector<8x128xf32> to vector<8x32xf32>
    %86 = vector.extract_strided_slice %81 {offsets = [0, 32], sizes = [8, 32], strides = [1, 1]} : vector<8x128xf32> to vector<8x32xf32>
    %87 = arith.mulf %86, %71 : vector<8x32xf32>
    %88 = arith.mulf %83, %85 : vector<8x32xf32>
    %89 = arith.addf %87, %88 : vector<8x32xf32>
    %90 = math.tanh %89 : vector<8x32xf32>
    %91 = arith.mulf %84, %90 : vector<8x32xf32>
    %92 = vector.extract_strided_slice %5 {offsets = [40, 0], sizes = [8, 128], strides = [1, 1]} : vector<64x128xf32> to vector<8x128xf32>
    %cst_16 = arith.constant dense<0.000000e+00> : vector<8x128xf32>
    %93 = tpu.matmul %91, %6, %cst_16 {dimension_numbers = #tpu.dot_dimension_numbers<[1], [0], [0], [1], [0, 0, 1, 1], [], []>} : vector<8x32xf32>, vector<32x128xf32>, vector<8x128xf32> -> vector<8x128xf32>
    %94 = arith.addf %92, %93 : vector<8x128xf32>
    %95 = arith.negf %94 : vector<8x128xf32>
    %96 = math.exp %95 : vector<8x128xf32>
    %cst_17 = arith.constant 1.000000e+00 : f32
    %97 = vector.broadcast %cst_17 : f32 to vector<8x128xf32>
    %98 = arith.addf %97, %96 : vector<8x128xf32>
    %99 = arith.divf %97, %98 : vector<8x128xf32>
    %100 = math.tanh %94 : vector<8x128xf32>
    %101 = vector.extract_strided_slice %99 {offsets = [0, 0], sizes = [8, 32], strides = [1, 1]} : vector<8x128xf32> to vector<8x32xf32>
    %102 = vector.extract_strided_slice %99 {offsets = [0, 96], sizes = [8, 32], strides = [1, 1]} : vector<8x128xf32> to vector<8x32xf32>
    %103 = vector.extract_strided_slice %100 {offsets = [0, 64], sizes = [8, 32], strides = [1, 1]} : vector<8x128xf32> to vector<8x32xf32>
    %104 = vector.extract_strided_slice %99 {offsets = [0, 32], sizes = [8, 32], strides = [1, 1]} : vector<8x128xf32> to vector<8x32xf32>
    %105 = arith.mulf %104, %89 : vector<8x32xf32>
    %106 = arith.mulf %101, %103 : vector<8x32xf32>
    %107 = arith.addf %105, %106 : vector<8x32xf32>
    %108 = math.tanh %107 : vector<8x32xf32>
    %109 = arith.mulf %102, %108 : vector<8x32xf32>
    %110 = vector.extract_strided_slice %5 {offsets = [48, 0], sizes = [8, 128], strides = [1, 1]} : vector<64x128xf32> to vector<8x128xf32>
    %cst_18 = arith.constant dense<0.000000e+00> : vector<8x128xf32>
    %111 = tpu.matmul %109, %6, %cst_18 {dimension_numbers = #tpu.dot_dimension_numbers<[1], [0], [0], [1], [0, 0, 1, 1], [], []>} : vector<8x32xf32>, vector<32x128xf32>, vector<8x128xf32> -> vector<8x128xf32>
    %112 = arith.addf %110, %111 : vector<8x128xf32>
    %113 = arith.negf %112 : vector<8x128xf32>
    %114 = math.exp %113 : vector<8x128xf32>
    %cst_19 = arith.constant 1.000000e+00 : f32
    %115 = vector.broadcast %cst_19 : f32 to vector<8x128xf32>
    %116 = arith.addf %115, %114 : vector<8x128xf32>
    %117 = arith.divf %115, %116 : vector<8x128xf32>
    %118 = math.tanh %112 : vector<8x128xf32>
    %119 = vector.extract_strided_slice %117 {offsets = [0, 0], sizes = [8, 32], strides = [1, 1]} : vector<8x128xf32> to vector<8x32xf32>
    %120 = vector.extract_strided_slice %117 {offsets = [0, 96], sizes = [8, 32], strides = [1, 1]} : vector<8x128xf32> to vector<8x32xf32>
    %121 = vector.extract_strided_slice %118 {offsets = [0, 64], sizes = [8, 32], strides = [1, 1]} : vector<8x128xf32> to vector<8x32xf32>
    %122 = vector.extract_strided_slice %117 {offsets = [0, 32], sizes = [8, 32], strides = [1, 1]} : vector<8x128xf32> to vector<8x32xf32>
    %123 = arith.mulf %122, %107 : vector<8x32xf32>
    %124 = arith.mulf %119, %121 : vector<8x32xf32>
    %125 = arith.addf %123, %124 : vector<8x32xf32>
    %126 = math.tanh %125 : vector<8x32xf32>
    %127 = arith.mulf %120, %126 : vector<8x32xf32>
    %128 = vector.extract_strided_slice %5 {offsets = [56, 0], sizes = [8, 128], strides = [1, 1]} : vector<64x128xf32> to vector<8x128xf32>
    %cst_20 = arith.constant dense<0.000000e+00> : vector<8x128xf32>
    %129 = tpu.matmul %127, %6, %cst_20 {dimension_numbers = #tpu.dot_dimension_numbers<[1], [0], [0], [1], [0, 0, 1, 1], [], []>} : vector<8x32xf32>, vector<32x128xf32>, vector<8x128xf32> -> vector<8x128xf32>
    %130 = arith.addf %128, %129 : vector<8x128xf32>
    %131 = arith.negf %130 : vector<8x128xf32>
    %132 = math.exp %131 : vector<8x128xf32>
    %cst_21 = arith.constant 1.000000e+00 : f32
    %133 = vector.broadcast %cst_21 : f32 to vector<8x128xf32>
    %134 = arith.addf %133, %132 : vector<8x128xf32>
    %135 = arith.divf %133, %134 : vector<8x128xf32>
    %136 = math.tanh %130 : vector<8x128xf32>
    %137 = vector.extract_strided_slice %135 {offsets = [0, 0], sizes = [8, 32], strides = [1, 1]} : vector<8x128xf32> to vector<8x32xf32>
    %138 = vector.extract_strided_slice %135 {offsets = [0, 96], sizes = [8, 32], strides = [1, 1]} : vector<8x128xf32> to vector<8x32xf32>
    %139 = vector.extract_strided_slice %136 {offsets = [0, 64], sizes = [8, 32], strides = [1, 1]} : vector<8x128xf32> to vector<8x32xf32>
    %140 = vector.extract_strided_slice %135 {offsets = [0, 32], sizes = [8, 32], strides = [1, 1]} : vector<8x128xf32> to vector<8x32xf32>
    %141 = arith.mulf %140, %125 : vector<8x32xf32>
    %142 = arith.mulf %137, %139 : vector<8x32xf32>
    %143 = arith.addf %141, %142 : vector<8x32xf32>
    %144 = math.tanh %143 : vector<8x32xf32>
    %145 = arith.mulf %138, %144 : vector<8x32xf32>
    %cst_22 = arith.constant 0.000000e+00 : f32
    %146 = vector.broadcast %cst_22 : f32 to vector<8x32xf32>
    %147 = arith.maximumf %145, %146 : vector<8x32xf32>
    %c0_23 = arith.constant 0 : index
    %c0_24 = arith.constant 0 : index
    %148 = vector.load %arg4[%c0_23, %c0_24] : memref<32x128xf32, #tpu.memory_space<vmem>>, vector<32x128xf32>
    %cst_25 = arith.constant dense<0.000000e+00> : vector<8x128xf32>
    %149 = tpu.matmul %147, %148, %cst_25 {dimension_numbers = #tpu.dot_dimension_numbers<[1], [0], [0], [1], [0, 0, 1, 1], [], []>} : vector<8x32xf32>, vector<32x128xf32>, vector<8x128xf32> -> vector<8x128xf32>
    %c0_26 = arith.constant 0 : index
    %c0_27 = arith.constant 0 : index
    %150 = vector.load %arg5[%c0_26, %c0_27] : memref<1x128xf32, #tpu.memory_space<vmem>>, vector<1x128xf32>
    %151 = vector.broadcast %150 : vector<1x128xf32> to vector<8x128xf32>
    %152 = arith.addf %149, %151 : vector<8x128xf32>
    %c0_28 = arith.constant 0 : index
    %c0_29 = arith.constant 0 : index
    %153 = vector.load %arg6[%c0_28, %c0_29] : memref<8x128xf32, #tpu.memory_space<vmem>>, vector<8x128xf32>
    tpu.vector_store %arg6[%c0_28, %c0_29], %152 {strides = array<i32>} : memref<8x128xf32, #tpu.memory_space<vmem>>, vector<8x128xf32>,
    return
  }
}

</mosaic_0001>

<bundles_post_ra>
// kernel: tpu_custom_call.1
= control target key start
LH: loop header
LB: loop body
LE: loop exit
PB: predicated region body
PF: predicated region fallthrough
CT: control target
= control target key end

     0   :  { %vm41_vm0 = vcmask 130048   ;;  %s1557_s0 = inlined_call_operand.vmem [shape: f32[64,16], index: 0, kind: input, shape index: {}]   ;;  %s1558_s1 = inlined_call_operand.vmem [shape: f32[16,128], index: 1, kind: input, shape index: {}]   ;;  %s1559_s2 = inlined_call_operand.vmem [shape: f32[32,128], index: 2, kind: input, shape index: {}]   ;;  %s1560_s3 = inlined_call_operand.vmem [shape: f32[1,128], index: 3, kind: input, shape index: {}]   ;;  %s1561_s4 = inlined_call_operand.vmem [shape: f32[32,128], index: 4, kind: input, shape index: {}]   ;;  %s1562_s5 = inlined_call_operand.vmem [shape: f32[1,128], index: 5, kind: input, shape index: {}]   ;;  %s1563_s6 = inlined_call_operand.hbm [shape: f32[8,128], index: 6, kind: output, shape index: {}]  }
   0x1   :  { %v32_v0 = vld [vmem:[%s1558_s1] sm:$0xff]  ;;  %v33_v1 = vld [vmem:[%s1558_s1 + $0x8] sm:$0xff] }
   0x2   :  { %v24_v2 = vld [vmem:[%s1557_s0] sm:$0xff]  ;;  %v1180_v3 = vpack.c.bf16 %v33_v1, %v32_v0 }
   0x3   :  { %1080 = vmatprep.mubr.msk.f32.mxu0 %vm41_vm0, %v24_v2 }
   0x4   :  { %11 = vsyncpa [#allocation3], 0  ;;  %1181 = vmatprep.subr.bf16.mxu0 %v1180_v3  ;;  %v25_v4 = vld [vmem:[%s1557_s0 + $0x8] sm:$0xff]  ;;  %v1386_v5 = vld [vmem:[%s1560_s3] ss:$0 sm:$0xff]  ;;  %s1327_s1 = smov 64  }
   0x5   :  { %1183 = vmatpush3.bf16.msra.mxu0 %v1180_v3  ;;  %v171_v16 = vld [vmem:[%s1559_s2] sm:$0xff]  ;;  %v172_v17 = vld [vmem:[%s1559_s2 + $0x8] sm:$0xff]  ;;  %v173_v18 = vld [vmem:[%s1559_s2 + $0x10] sm:$0xff]  ;;  %v1328_v19 = vmov 0.0|0.0   ;;  %vm1329_vm1 = vmmov 0   ;;  %v1330_v22 = vmov 0.0  }
   0x6   :  { %1184 = vmatprep.subr.bf16.mxu1 %v1328_v19  ;;  %v1400_v20 = vpack.c.bf16 %v172_v17, %v171_v16  ;;  %v174_v21 = vld [vmem:[%s1559_s2 + $0x18] sm:$0xff]  ;;  %1100 = vmatprep.mubr.msk.f32.mxu1 %vm1329_vm1, %v1330_v22  ;;  %s1331_s2 = smov 96   ;;  %s1332_s14 = smov 32   ;;  %vm196_vm2 = vcmask 261120   ;;  %v26_v43 = vld [vmem:[%s1557_s0 + $0x10] sm:$0xff]  ;;  %v28_v1 = vld [vmem:[%s1557_s0 + $0x20] sm:$0xff] }
   0x7   :  { %1196 = vmatprep.subr.bf16.mxu0 %v1328_v19  ;;  %v1409_v23 = vpack.c.bf16 %v174_v21, %v173_v18  ;;  %v27_v44 = vld [vmem:[%s1557_s0 + $0x18] sm:$0xff]  ;;  %v29_v2 = vld [vmem:[%s1557_s0 + $0x28] sm:$0xff]  ;;  %v30_v3 = vld [vmem:[%s1557_s0 + $0x30] sm:$0xff] }
   0x8   :  { %1081 = vmatmul.mubr.msk.f32.vlgmr.msra.gmra.mrb[0].mxu0 %vm41_vm0, %v25_v4  ;;  %1186 = vmatpush3.bf16.msra.mxu1 %v1400_v20  ;;  %v31_v4 = vld [vmem:[%s1557_s0 + $0x38] sm:$0xff] }
   0x9   :  { %1198 = vmatpush3.bf16.msra.mxu0 %v1400_v20  ;;  %1187 = vmatprep.subr.bf16.mxu1 %v1328_v19 }
   0xa   :  { %1199 = vmatprep.subr.bf16.mxu0 %v1328_v19  ;;  %1083 = vmatprep.mubr.msk.f32.mxu0 %vm41_vm0, %v26_v43 }
   0xc   :  { %1189 = vmatpush3.bf16.msra.mxu1 %v1409_v23  ;;  %1084 = vmatmul.mubr.msk.f32.gmra.mrb[2].mxu0 %vm41_vm0, %v27_v44 }
   0xd   :  { %1201 = vmatpush3.bf16.msra.mxu0 %v1409_v23  ;;  %1190 = vmatprep.subr.bf16.mxu1 %v1328_v19 }
   0xe   :  { %1208 = vmatprep.subr.bf16.mxu0 %v1328_v19  ;;  %1086 = vmatprep.mubr.msk.f32.mxu0 %vm41_vm0, %v28_v1 }
  0x10   :  { %1087 = vmatmul.mubr.msk.f32.gmra.mrb[4].mxu0 %vm41_vm0, %v29_v2 }
  0x11   :  { %1089 = vmatprep.mubr.msk.f32.mxu0 %vm41_vm0, %v30_v3 }
  0x14   :  { %1090 = vmatmul.mubr.msk.f32.gmra.mrb[6].mxu0 %vm41_vm0, %v31_v4 }
  0x15   :  { %1122 = vmatprep.mubr.msk.f32.mxu0 %vm1329_vm1, %v1330_v22 }
  0xdb   :  { %v1082_v6 = vpop.f32.mrb[0].mxu0 }
  0xdc   :  { %v132_v7 = vpop.f32.mrb[1].mxu0  ;;  %v138_v28 = vadd.f32 %v1082_v6, %v1386_v5 }
  0xdd   :  { %v133_v8 = vadd.f32 %v1386_v5, %v132_v7 }
  0xdf   :  { %1239 = vtanh.f32 %v133_v8  ;;  %v1009_v10 = vmul.f32 -1.442695, %v133_v8  ;;  %v1085_v48 = vpop.f32.mrb[2].mxu0 }
  0xe0   :  { %v142_v49 = vpop.f32.mrb[3].mxu0 }
  0xe1   :  { %1241 = vpow2.f32 %v1009_v10  ;;  %v143_v51 = vadd.f32 %v1386_v5, %v142_v49 }
  0xe9   :  { %v1240_v9 = vpop.eup %1239 }
  0xea   :  { %183 = vrot.lane.b32.xlu0 %v1240_v9, %s1327_s1  ;;  %v1470_v9 = vpop.f32.mrb[4].mxu0 }
  0xeb   :  { %v1242_v11 = vpop.eup %1241  ;;  %v152_v10 = vpop.f32.mrb[5].mxu0 }
  0xec   :  { %v178_v12 = vadd.f32 1.0, %v1242_v11  ;;  %v1472_v11 = vpop.f32.mrb[6].mxu0 }
  0xee   :  { %1243 = vrcp.f32 %v178_v12  ;;  %v1474_v12 = vpop.f32.mrb[7].mxu0 }
  0xf8   :  { %v1244_v13 = vpop.eup %1243 }
 0x15c   :  { %v184_v14 = vpop.permute.xlu0 %183 }
 0x15d   :  { %v186_v15 = vmul.f32 %v1244_v13, %v184_v14  ;;  %v148_v14 = vadd.f32 %v1085_v48, %v1386_v5 }
 0x15f   :  { %1245 = vtanh.f32 %v186_v15 }
 0x169   :  { %v1246_v24 = vpop.eup %1245 }
 0x16a   :  { %189 = vrot.lane.b32.xlu0 %v1246_v24, %s1331_s2 }
 0x16e   :  { %278 = vrot.lane.b32.xlu0 %v186_v15, %s1332_s14 }
 0x1dc   :  { %v190_v25 = vpop.permute.xlu0 %189 }
 0x1dd   :  { %v192_v26 = vmul.f32 %v1244_v13, %v190_v25 }
 0x1df   :  { %194 = vrot.lane.b32.xlu1 %v192_v26, %s1332_s14 }
 0x1e0   :  { %v279_v39 = vpop.permute.xlu0 %278 }
 0x251   :  { %v195_v27 = vpop.permute.xlu1 %194 }
 0x252   :  { %1101 = vmatmul.mubr.msk.f32.vlgmr.msra.gmra.mrb[0].mxu1 %vm196_vm2, %v195_v27 }
 0x253   :  { %1192 = vmatpush3.bf16.msra.mxu1 %v1400_v20  ;;  %1111 = vmatprep.mubr.msk.f32.mxu1 %vm1329_vm1, %v1330_v22 }
 0x254   :  { %1193 = vmatprep.subr.bf16.mxu1 %v1328_v19 }
 0x257   :  { %1195 = vmatpush3.bf16.msra.mxu1 %v1409_v23 }
 0x258   :  { %1202 = vmatprep.subr.bf16.mxu1 %v1328_v19 }
 0x325   :  { %v265_v29 = vpop.f32.mrb[0].mxu1 }
 0x326   :  { %v269_v30 = vadd.f32 %v265_v29, %v138_v28  ;;  %v1102_v31 = vpop.f32.mrb[1].mxu1 }
 0x328   :  { %1247 = vtanh.f32 %v269_v30  ;;  %v1011_v33 = vmul.f32 -1.442695, %v269_v30 }
 0x32a   :  { %1249 = vpow2.f32 %v1011_v33 }
 0x332   :  { %v1248_v32 = vpop.eup %1247 }
 0x333   :  { %283 = vrot.lane.b32.xlu1 %v1248_v32, %s1327_s1 }
 0x334   :  { %v1250_v34 = vpop.eup %1249 }
 0x335   :  { %v273_v35 = vadd.f32 1.0, %v1250_v34 }
 0x337   :  { %1251 = vrcp.f32 %v273_v35 }
 0x341   :  { %v1252_v36 = vpop.eup %1251 }
 0x342   :  { %v281_v40 = vmul.f32 %v1252_v36, %v279_v39 }
 0x3a5   :  { %v284_v37 = vpop.permute.xlu1 %283 }
 0x3a6   :  { %v286_v38 = vmul.f32 %v1252_v36, %v284_v37 }
 0x3a8   :  { %288 = vrot.lane.b32.xlu1 %v286_v38, %s1332_s14 }
 0x41a   :  { %v289_v41 = vpop.permute.xlu1 %288 }
 0x41b   :  { %v291_v42 = vadd.f32 %v289_v41, %v281_v40 }
 0x41d   :  { %1253 = vtanh.f32 %v291_v42 }
 0x427   :  { %v1254_v45 = vpop.eup %1253 }
 0x428   :  { %294 = vrot.lane.b32.xlu0 %v1254_v45, %s1327_s1 }
 0x49a   :  { %v295_v46 = vpop.permute.xlu0 %294 }
 0x49b   :  { %v297_v47 = vmul.f32 %v1252_v36, %v295_v46  ;;  %v153_v36 = vadd.f32 %v1386_v5, %v152_v10 }
 0x49d   :  { %299 = vrot.lane.b32.xlu1 %v297_v47, %s1332_s14 }
 0x50f   :  { %v300_v50 = vpop.permute.xlu1 %299 }
 0x510   :  { %1112 = vmatmul.mubr.msk.f32.vlgmr.msra.gmra.mrb[2].mxu1 %vm196_vm2, %v300_v50 }
 0x511   :  { %1204 = vmatpush3.bf16.msra.mxu1 %v1400_v20  ;;  %1133 = vmatprep.mubr.msk.f32.mxu1 %vm1329_vm1, %v1330_v22 }
 0x512   :  { %1205 = vmatprep.subr.bf16.mxu1 %v1328_v19 }
 0x515   :  { %1207 = vmatpush3.bf16.msra.mxu1 %v1409_v23 }
 0x516   :  { %1214 = vmatprep.subr.bf16.mxu1 %v1328_v19 }
 0x5e3   :  { %v369_v52 = vpop.f32.mrb[2].mxu1 }
 0x5e4   :  { %v373_v53 = vadd.f32 %v369_v52, %v143_v51  ;;  %v1113_v54 = vpop.f32.mrb[3].mxu1 }
 0x5e5   :  { %v158_v54 = vadd.f32 %v1470_v9, %v1386_v5 }
 0x5e6   :  { %1255 = vtanh.f32 %v373_v53  ;;  %v1013_v56 = vmul.f32 -1.442695, %v373_v53 }
 0x5e8   :  { %1257 = vpow2.f32 %v1013_v56 }
 0x5f0   :  { %v1256_v55 = vpop.eup %1255 }
 0x5f1   :  { %383 = vrot.lane.b32.xlu0 %v1256_v55, %s1327_s1 }
 0x5f2   :  { %v1258_v57 = vpop.eup %1257 }
 0x5f3   :  { %v377_v58 = vadd.f32 1.0, %v1258_v57 }
 0x5f5   :  { %1259 = vrcp.f32 %v377_v58 }
 0x5ff   :  { %v1260_v59 = vpop.eup %1259 }
 0x600   :  { %v381_v62 = vmul.f32 %v1260_v59, %v291_v42 }
 0x663   :  { %v384_v60 = vpop.permute.xlu0 %383 }
 0x664   :  { %v386_v61 = vmul.f32 %v1260_v59, %v384_v60 }
 0x666   :  { %388 = vrot.lane.b32.xlu1 %v386_v61, %s1332_s14 }
 0x6d8   :  { %v389_v63 = vpop.permute.xlu1 %388 }
 0x6d9   :  { %v391_v0 = vadd.f32 %v389_v63, %v381_v62 }
 0x6db   :  { %1261 = vtanh.f32 %v391_v0 }
 0x6e5   :  { %v1262_v6 = vpop.eup %1261 }
 0x6e6   :  { %394 = vrot.lane.b32.xlu0 %v1262_v6, %s1327_s1 }
 0x758   :  { %v395_v7 = vpop.permute.xlu0 %394 }
 0x759   :  { %v397_v8 = vmul.f32 %v1260_v59, %v395_v7  ;;  %v163_v7 = vadd.f32 %v1386_v5, %v1474_v12 }
 0x75b   :  { %399 = vrot.lane.b32.xlu1 %v397_v8, %s1332_s14 }
 0x7cd   :  { %v400_v13 = vpop.permute.xlu1 %399 }
 0x7ce   :  { %1123 = vmatmul.mubr.msk.f32.vlgmr.msra.gmra.mrb[8].mxu0 %vm196_vm2, %v400_v13 }
 0x7cf   :  { %1210 = vmatpush3.bf16.msra.mxu0 %v1400_v20  ;;  %1144 = vmatprep.mubr.msk.f32.mxu0 %vm1329_vm1, %v1330_v22 }
 0x7d0   :  { %1211 = vmatprep.subr.bf16.mxu0 %v1328_v19 }
 0x7d3   :  { %1213 = vmatpush3.bf16.msra.mxu0 %v1409_v23 }
 0x7d4   :  { %1220 = vmatprep.subr.bf16.mxu0 %v1328_v19 }
 0x8a1   :  { %v469_v15 = vpop.f32.mrb[8].mxu0 }
 0x8a2   :  { %v473_v16 = vadd.f32 %v469_v15, %v148_v14  ;;  %v1124_v17 = vpop.f32.mrb[9].mxu0 }
 0x8a4   :  { %1263 = vtanh.f32 %v473_v16  ;;  %v1015_v21 = vmul.f32 -1.442695, %v473_v16 }
 0x8a6   :  { %1265 = vpow2.f32 %v1015_v21 }
 0x8ae   :  { %v1264_v18 = vpop.eup %1263 }
 0x8af   :  { %483 = vrot.lane.b32.xlu0 %v1264_v18, %s1327_s1 }
 0x8b0   :  { %v1266_v24 = vpop.eup %1265 }
 0x8b1   :  { %v477_v25 = vadd.f32 1.0, %v1266_v24 }
 0x8b3   :  { %1267 = vrcp.f32 %v477_v25 }
 0x8bd   :  { %v1268_v26 = vpop.eup %1267 }
 0x8be   :  { %v481_v29 = vmul.f32 %v1268_v26, %v391_v0 }
 0x921   :  { %v484_v27 = vpop.permute.xlu0 %483 }
 0x922   :  { %v486_v28 = vmul.f32 %v1268_v26, %v484_v27 }
 0x924   :  { %488 = vrot.lane.b32.xlu1 %v486_v28, %s1332_s14 }
 0x996   :  { %v489_v30 = vpop.permute.xlu1 %488 }
 0x997   :  { %v491_v31 = vadd.f32 %v489_v30, %v481_v29  ;;  %v168_v29 = vadd.f32 %v1472_v11, %v1386_v5  ;;  %v899_v11 = vld [vmem:[%s1561_s4] sm:$0xff] }
 0x999   :  { %1269 = vtanh.f32 %v491_v31 }
 0x9a3   :  { %v1270_v32 = vpop.eup %1269 }
 0x9a4   :  { %494 = vrot.lane.b32.xlu0 %v1270_v32, %s1327_s1 }
 0xa16   :  { %v495_v33 = vpop.permute.xlu0 %494 }
 0xa17   :  { %v497_v34 = vmul.f32 %v1268_v26, %v495_v33 }
 0xa19   :  { %499 = vrot.lane.b32.xlu1 %v497_v34, %s1332_s14 }
 0xa8b   :  { %v500_v35 = vpop.permute.xlu1 %499 }
 0xa8c   :  { %1134 = vmatmul.mubr.msk.f32.vlgmr.msra.gmra.mrb[4].mxu1 %vm196_vm2, %v500_v35 }
 0xa8d   :  { %1216 = vmatpush3.bf16.msra.mxu1 %v1400_v20  ;;  %1155 = vmatprep.mubr.msk.f32.mxu1 %vm1329_vm1, %v1330_v22 }
 0xa8e   :  { %1217 = vmatprep.subr.bf16.mxu1 %v1328_v19 }
 0xa91   :  { %1219 = vmatpush3.bf16.msra.mxu1 %v1409_v23 }
 0xa92   :  { %1226 = vmatprep.subr.bf16.mxu1 %v1328_v19 }
 0xb5f   :  { %v569_v37 = vpop.f32.mrb[4].mxu1 }
 0xb60   :  { %v573_v38 = vadd.f32 %v569_v37, %v153_v36  ;;  %v1135_v39 = vpop.f32.mrb[5].mxu1 }
 0xb62   :  { %1271 = vtanh.f32 %v573_v38  ;;  %v1017_v41 = vmul.f32 -1.442695, %v573_v38 }
 0xb64   :  { %1273 = vpow2.f32 %v1017_v41 }
 0xb6c   :  { %v1272_v40 = vpop.eup %1271 }
 0xb6d   :  { %583 = vrot.lane.b32.xlu0 %v1272_v40, %s1327_s1 }
 0xb6e   :  { %v1274_v42 = vpop.eup %1273 }
 0xb6f   :  { %v577_v43 = vadd.f32 1.0, %v1274_v42  ;;  %v900_v42 = vld [vmem:[%s1561_s4 + $0x8] sm:$0xff] }
 0xb71   :  { %1275 = vrcp.f32 %v577_v43  ;;  %v901_v43 = vld [vmem:[%s1561_s4 + $0x10] sm:$0xff] }
 0xb7b   :  { %v1276_v44 = vpop.eup %1275 }
 0xb7c   :  { %v581_v47 = vmul.f32 %v1276_v44, %v491_v31 }
 0xbdf   :  { %v584_v45 = vpop.permute.xlu0 %583 }
 0xbe0   :  { %v586_v46 = vmul.f32 %v1276_v44, %v584_v45  ;;  %v902_v45 = vld [vmem:[%s1561_s4 + $0x18] sm:$0xff]  ;;  %s1333_s4 = smov [#allocation2]  }
 0xbe1   :  { %s992_s11 = sshll.u32 %s1333_s4, 4  ;;  %s993_s11 = int_to_ptr.vmem [resolvable:$true] %s992_s11 }
 0xbe2   :  { %588 = vrot.lane.b32.xlu1 %v586_v46, %s1332_s14  ;;  %v1230_v46 = vpack.c.bf16 %v902_v45, %v901_v43  ;;  %p1308_p1 = scmp.lt.s32.totalorder %s993_s11, %s993_s11 }
 0xc54   :  { %v589_v48 = vpop.permute.xlu1 %588 }
 0xc55   :  { %v591_v49 = vadd.f32 %v589_v48, %v581_v47 }
 0xc57   :  { %1277 = vtanh.f32 %v591_v49 }
 0xc61   :  { %v1278_v50 = vpop.eup %1277 }
 0xc62   :  { %594 = vrot.lane.b32.xlu0 %v1278_v50, %s1327_s1 }
 0xcd4   :  { %v595_v51 = vpop.permute.xlu0 %594 }
 0xcd5   :  { %v597_v52 = vmul.f32 %v1276_v44, %v595_v51  ;;  %v1227_v44 = vpack.c.bf16 %v900_v42, %v899_v11 }
 0xcd7   :  { %599 = vrot.lane.b32.xlu1 %v597_v52, %s1332_s14  ;;  %v1024_v52 = vld [vmem:[%s1562_s5] ss:$0 sm:$0xff] }
 0xd49   :  { %v600_v53 = vpop.permute.xlu1 %599 }
 0xd4a   :  { %1145 = vmatmul.mubr.msk.f32.vlgmr.msra.gmra.mrb[10].mxu0 %vm196_vm2, %v600_v53 }
 0xd4b   :  { %1222 = vmatpush3.bf16.msra.mxu0 %v1400_v20  ;;  %1166 = vmatprep.mubr.msk.f32.mxu0 %vm1329_vm1, %v1330_v22 }
 0xd4c   :  { %1223 = vmatprep.subr.bf16.mxu0 %v1328_v19 }
 0xd4f   :  { %1225 = vmatpush3.bf16.msra.mxu0 %v1409_v23 }
 0xe1d   :  { %v669_v55 = vpop.f32.mrb[10].mxu0 }
 0xe1e   :  { %v673_v56 = vadd.f32 %v669_v55, %v158_v54  ;;  %v1146_v57 = vpop.f32.mrb[11].mxu0 }
 0xe20   :  { %1279 = vtanh.f32 %v673_v56  ;;  %v1019_v59 = vmul.f32 -1.442695, %v673_v56 }
 0xe22   :  { %1281 = vpow2.f32 %v1019_v59 }
 0xe2a   :  { %v1280_v58 = vpop.eup %1279 }
 0xe2b   :  { %683 = vrot.lane.b32.xlu0 %v1280_v58, %s1327_s1 }
 0xe2c   :  { %v1282_v20 = vpop.eup %1281 }
 0xe2d   :  { %v677_v60 = vadd.f32 1.0, %v1282_v20 }
 0xe2f   :  { %1283 = vrcp.f32 %v677_v60 }
 0xe39   :  { %v1284_v61 = vpop.eup %1283 }
 0xe3a   :  { %v681_v23 = vmul.f32 %v1284_v61, %v591_v49 }
 0xe9d   :  { %v684_v62 = vpop.permute.xlu0 %683 }
 0xe9e   :  { %v686_v63 = vmul.f32 %v1284_v61, %v684_v62 }
 0xea0   :  { %688 = vrot.lane.b32.xlu1 %v686_v63, %s1332_s14 }
 0xf12   :  { %v689_v0 = vpop.permute.xlu1 %688 }
 0xf13   :  { %v691_v1 = vadd.f32 %v689_v0, %v681_v23 }
 0xf15   :  { %1285 = vtanh.f32 %v691_v1 }
 0xf1f   :  { %v1286_v2 = vpop.eup %1285 }
 0xf20   :  { %694 = vrot.lane.b32.xlu0 %v1286_v2, %s1327_s1 }
 0xf92   :  { %v695_v3 = vpop.permute.xlu0 %694 }
 0xf93   :  { %v697_v4 = vmul.f32 %v1284_v61, %v695_v3 }
 0xf95   :  { %699 = vrot.lane.b32.xlu1 %v697_v4, %s1332_s14 }
0x1007   :  { %v700_v6 = vpop.permute.xlu1 %699 }
0x1008   :  { %1156 = vmatmul.mubr.msk.f32.vlgmr.msra.gmra.mrb[6].mxu1 %vm196_vm2, %v700_v6 }
0x1009   :  { %1177 = vmatprep.mubr.msk.f32.mxu1 %vm1329_vm1, %v1330_v22  ;;  %1228 = vmatpush3.bf16.msra.mxu1 %v1227_v44 }
0x100a   :  { %1229 = vmatprep.subr.bf16.mxu1 %v1328_v19 }
0x100d   :  { %1231 = vmatpush3.bf16.msra.mxu1 %v1230_v46 }
0x10db   :  { %v769_v8 = vpop.f32.mrb[6].mxu1 }
0x10dc   :  { %v773_v9 = vadd.f32 %v769_v8, %v163_v7  ;;  %v1157_v10 = vpop.f32.mrb[7].mxu1 }
0x10de   :  { %1287 = vtanh.f32 %v773_v9  ;;  %v1021_v14 = vmul.f32 -1.442695, %v773_v9 }
0x10e0   :  { %1289 = vpow2.f32 %v1021_v14 }
0x10e8   :  { %v1288_v13 = vpop.eup %1287 }
0x10e9   :  { %783 = vrot.lane.b32.xlu0 %v1288_v13, %s1327_s1 }
0x10ea   :  { %v1290_v15 = vpop.eup %1289 }
0x10eb   :  { %v777_v16 = vadd.f32 1.0, %v1290_v15 }
0x10ed   :  { %1291 = vrcp.f32 %v777_v16 }
0x10f7   :  { %v1292_v17 = vpop.eup %1291 }
0x10f8   :  { %v781_v22 = vmul.f32 %v1292_v17, %v691_v1 }
0x115b   :  { %v784_v18 = vpop.permute.xlu0 %783 }
0x115c   :  { %v786_v21 = vmul.f32 %v1292_v17, %v784_v18 }
0x115e   :  { %788 = vrot.lane.b32.xlu1 %v786_v21, %s1332_s14 }
0x11d0   :  { %v789_v24 = vpop.permute.xlu1 %788 }
0x11d1   :  { %v791_v12 = vadd.f32 %v789_v24, %v781_v22 }
0x11d3   :  { %1293 = vtanh.f32 %v791_v12 }
0x11dd   :  { %v1294_v25 = vpop.eup %1293 }
0x11de   :  { %794 = vrot.lane.b32.xlu0 %v1294_v25, %s1327_s1 }
0x1250   :  { %v795_v26 = vpop.permute.xlu0 %794 }
0x1251   :  { %v797_v27 = vmul.f32 %v1292_v17, %v795_v26 }
0x1253   :  { %799 = vrot.lane.b32.xlu1 %v797_v27, %s1332_s14 }
0x12c5   :  { %v800_v28 = vpop.permute.xlu1 %799 }
0x12c6   :  { %1167 = vmatmul.mubr.msk.f32.vlgmr.msra.gmra.mrb[12].mxu0 %vm196_vm2, %v800_v28 }
0x1399   :  { %v869_v30 = vpop.f32.mrb[12].mxu0 }
0x139a   :  { %v873_v31 = vadd.f32 %v869_v30, %v168_v29  ;;  %v1168_v32 = vpop.f32.mrb[13].mxu0 }
0x139c   :  { %1295 = vtanh.f32 %v873_v31  ;;  %v1023_v34 = vmul.f32 -1.442695, %v873_v31 }
0x139e   :  { %1297 = vpow2.f32 %v1023_v34 }
0x13a6   :  { %v1296_v33 = vpop.eup %1295 }
0x13a7   :  { %883 = vrot.lane.b32.xlu0 %v1296_v33, %s1327_s1 }
0x13a8   :  { %v1298_v35 = vpop.eup %1297 }
0x13a9   :  { %v877_v36 = vadd.f32 1.0, %v1298_v35 }
0x13ab   :  { %1299 = vrcp.f32 %v877_v36 }
0x13b5   :  { %v1300_v37 = vpop.eup %1299 }
0x13b6   :  { %v881_v40 = vmul.f32 %v1300_v37, %v791_v12 }
0x1419   :  { %v884_v38 = vpop.permute.xlu0 %883 }
0x141a   :  { %v886_v39 = vmul.f32 %v1300_v37, %v884_v38 }
0x141c   :  { %888 = vrot.lane.b32.xlu1 %v886_v39, %s1332_s14 }
0x148e   :  { %v889_v41 = vpop.permute.xlu1 %888 }
0x148f   :  { %v891_v5 = vadd.f32 %v889_v41, %v881_v40 }
0x1491   :  { %1301 = vtanh.f32 %v891_v5 }
0x149b   :  { %v1302_v47 = vpop.eup %1301 }
0x149c   :  { %894 = vrot.lane.b32.xlu0 %v1302_v47, %s1327_s1  ;;  %s1303_s1 = scalar_lea.vmem %s993_s11, 128 }
0x149d   :  { %p1304_p0 = scmp.ne.s32.totalorder %s993_s11, %s1303_s1  ;;  %p1309_p2 = scmp.lt.s32.totalorder %s1303_s1, %s1303_s1 }
0x149f   :  { %p1310_p3 = por %p1309_p2, %p1308_p1 }
0x14a1   :  { %p1311_p4 = pnand %p1310_p3, %p1304_p0 }
0x150e   :  { %v895_v48 = vpop.permute.xlu0 %894 }
0x150f   :  { %v897_v49 = vmul.f32 %v1300_v37, %v895_v48 }
0x1511   :  { %v898_v50 = vmax.f32 %v897_v49, 0.0 }
0x1513   :  { %911 = vrot.lane.b32.xlu1 %v898_v50, %s1332_s14 }
0x1585   :  { %v912_v51 = vpop.permute.xlu1 %911 }
0x1586   :  { %1178 = vmatmul.mubr.msk.f32.vlgmr.msra.gmra.mrb[8].mxu1 %vm196_vm2, %v912_v51 }
0x1659   :  { %v981_v53 = vpop.f32.mrb[8].mxu1 }
0x165a   :  { %v982_v19 = vadd.f32 %v1024_v52, %v981_v53  ;;  %v1179_v54 = vpop.f32.mrb[9].mxu1 }
0x165c   :  { %985 = vst [vmem:[#allocation2] sm:$0xff] %v982_v19 }
0x165d   :  { %1314 = shalt.err (!%p1311_p4)
}
0x165e   :  { %s1315_s2 = scalar_lea.hbm %s1563_s6, 128 }
0x165f   :  { %p1316_p5 = scmp.ne.s32.totalorder %s1563_s6, %s1315_s2  ;;  %p1319_p6 = scmp.lt.u32.totalorder %s1315_s2, %s1563_s6 }
0x1661   :  { %p1321_p7 = pnand %p1319_p6, %p1316_p5 }
0x1663   :  { %1324 = shalt.err (!%p1321_p7)
}
0x1664   :  { %995 = dma.vmem_to_hbm [thread:$0]  %s993_s11, 128, %s1563_s6, [#allocation3]  }
0x1665   :  { %1325 = dma.done.wait [#allocation3], 128  }
0x1666   :  { %1326 = vsyncadd [#allocation3], 4294967168 }
0x1667   :  { %999 = vsyncpa [#allocation3], 1 }

</bundles_post_ra>
